<compile_context>
chip_gen: v5e
topology: v5e:2x2
jax: 0.10.0
libtpu: 0.0.40
codegen_flags: <defaults>
</compile_context>

<pallas_src>
import jax
import jax.numpy as jnp
from jax.experimental import pallas as pl
from jax.experimental.pallas import tpu as pltpu


def _round_up(x, m):
    return (x + m - 1) // m * m


def _vmem_limit_cap_bytes():
    """~75% of the physical per-core VMEM (generation-aware cap)."""
    try:
        cap = int(pltpu.get_tpu_info().vmem_capacity_bytes)
    except Exception:
        cap = 64 << 20  # conservative fallback: smallest per-core VMEM (v7x)
    return (cap * 3) // 4


def _stacked_lstm_kernel(x_ref, h0_ref, c0_ref, w_ref, h_out_ref, c_out_ref,
                         xh_carry):
    """One grid step == one LSTMCell layer (layer axis iterates sequentially).

    x_ref:     (B, Xp)          padded external input (read at layer 0 only)
    h0_ref:    (1, B, Hp)       previous hidden state for this layer
    c0_ref:    (1, B, Hp)       previous cell state for this layer
    w_ref:     (1, K, 4*Hp)     fused [W_ih ; W_hh ; bias] slab, K = Xp+Hp+16
    h_out_ref, c_out_ref:       (1, B, Hp) new states (aliased to h0/c0 buffers)
    xh_carry:  (B, K) f32 VMEM  fused carry [x | h | bias-ones], persists across
                                layers (input feeding).
    """
    layer = pl.program_id(0)
    bsz, xp = x_ref.shape
    hp = h_out_ref.shape[-1]
    kp = xh_carry.shape[-1]          # xp + hp + bias_rows

    # ---- Layer 0: seed the fused carry [ x | h | bias-ones ] -----------------
    @pl.when(layer == 0)
    def _():
        xh_carry[:, :xp] = x_ref[...].astype(jnp.float32)
        # Bias "ones" column: first bias column is 1, remaining pad columns 0.
        ones_blk = (jax.lax.broadcasted_iota(jnp.int32, (bsz, kp - xp - hp), 1)
                    == 0).astype(jnp.float32)
        xh_carry[:, xp + hp:] = ones_blk

    # Current layer's recurrent h goes into the middle of the carry.
    xh_carry[:, xp:xp + hp] = h0_ref[0].astype(jnp.float32)

    # ---- One fused MXU dot: gates = [x|h|1] @ [W_ih; W_hh; b] ----------------
    # Operands cast to the weight dtype (bf16-ready), accumulation in f32.
    w = w_ref[0]
    gates = jnp.dot(xh_carry[...].astype(w.dtype), w,
                    preferred_element_type=jnp.float32)        # (B, 4*Hp) f32

    # sigmoid(z) = 0.5*tanh(0.5*z) + 0.5  -> single EUP op per gate.
    def _sig(z):
        return 0.5 * jnp.tanh(0.5 * z) + 0.5

    # hp is a multiple of 128 -> lane-aligned gate slices.
    i_g = _sig(gates[:, 0 * hp:1 * hp])
    f_g = _sig(gates[:, 1 * hp:2 * hp])
    g_g = jnp.tanh(gates[:, 2 * hp:3 * hp])
    o_g = _sig(gates[:, 3 * hp:4 * hp])

    c_new = f_g * c0_ref[0].astype(jnp.float32) + i_g * g_g
    h_new = o_g * jnp.tanh(c_new)

    h_out_ref[0] = h_new.astype(h_out_ref.dtype)
    c_out_ref[0] = c_new.astype(c_out_ref.dtype)

    # Input feeding: next layer's x is this layer's h (dropout = identity, eval).
    xh_carry[:, :hp] = h_new
    if xp > hp:
        # Explicitly clear stale external-input columns after layer 0 so layers
        # >= 1 don't rely solely on the zero-padded W_ih rows to neutralize them.
        @pl.when(layer == 0)
        def _():
            xh_carry[:, hp:xp] = jnp.zeros((bsz, xp - hp), jnp.float32)


def _pad_gate_cols(w, hidden, h_pad):
    """(rows, 4*hidden) -> (rows, 4*h_pad), zero-padding each gate block."""
    rows = w.shape[0]
    w4 = w.reshape(rows, 4, hidden)
    w4 = jnp.pad(w4, ((0, 0), (0, 0), (0, h_pad - hidden)))
    return w4.reshape(rows, 4 * h_pad)


def _pack_fused_params(params, rnn_size, x_pad, h_pad, bias_rows, dtype):
    """Per-layer fused slab [W_ih ; W_hh ; bias] -> (L, x_pad+h_pad+bias_rows, 4*h_pad)."""
    slabs = []
    for (w_ih_t, w_hh_t, b) in params:
        in_sz = w_ih_t.shape[0]
        w_ih_p = jnp.pad(_pad_gate_cols(w_ih_t, rnn_size, h_pad),
                         ((0, x_pad - in_sz), (0, 0)))
        w_hh_p = jnp.pad(_pad_gate_cols(w_hh_t, rnn_size, h_pad),
                         ((0, h_pad - rnn_size), (0, 0)))
        b_p = jnp.pad(_pad_gate_cols(b.reshape(1, 4 * rnn_size), rnn_size, h_pad),
                      ((0, bias_rows - 1), (0, 0)))
        slabs.append(jnp.concatenate([w_ih_p, w_hh_p, b_p], axis=0).astype(dtype))
    return jnp.stack(slabs)


def stacked_lstm_forward(input_feed, h_0, c_0, params):
    """Reproduces StackedLSTM.forward (eval mode).

    input_feed: (B, input_size)
    h_0, c_0:   (num_layers, B, rnn_size)
    params:     list of (w_ih_t (in,4H), w_hh_t (H,4H), b (4H,)) per layer.
    Returns (input_feed_out, (h_1, c_1)).
    """
    num_layers = len(params)
    batch, input_size = input_feed.shape
    rnn_size = h_0.shape[-1]

    b_pad = _round_up(max(batch, 8), 8)
    h_pad = _round_up(rnn_size, 128)
    x_pad = _round_up(max(input_size, rnn_size), 128)
    bias_rows = 16                      # keeps fused K a multiple of 16 (bf16 packing)
    k_rows = x_pad + h_pad + bias_rows

    w_dtype = params[0][0].dtype
    w_s = _pack_fused_params(params, rnn_size, x_pad, h_pad, bias_rows, w_dtype)

    state_dtype = jnp.float32           # recurrent state carried in f32
    x_p = jnp.zeros((b_pad, x_pad), jnp.float32)
    x_p = x_p.at[:batch, :input_size].set(input_feed.astype(jnp.float32))
    h0_p = jnp.zeros((num_layers, b_pad, h_pad), state_dtype)
    h0_p = h0_p.at[:, :batch, :rnn_size].set(h_0.astype(state_dtype))
    c0_p = jnp.zeros((num_layers, b_pad, h_pad), state_dtype)
    c0_p = c0_p.at[:, :batch, :rnn_size].set(c_0.astype(state_dtype))

    # VMEM budget: double-buffered fused weight slab + states + x + carry + headroom,
    # clamped to ~75% of the physical per-core VMEM of this TPU generation.
    witem = jnp.dtype(w_dtype).itemsize
    weight_bytes = 2 * k_rows * 4 * h_pad * witem              # 2 pipeline buffers
    state_bytes = 2 * 2 * 2 * b_pad * h_pad * 4                # h/c, in+out, 2 bufs
    misc_bytes = 2 * b_pad * x_pad * 4 + b_pad * k_rows * 4 + (4 << 20)
    needed = weight_bytes + state_bytes + misc_bytes
    vmem_limit = int(min(max(needed, 16 << 20), _vmem_limit_cap_bytes()))

    h_out_p, c_out_p = pl.pallas_call(
        _stacked_lstm_kernel,
        out_shape=(
            jax.ShapeDtypeStruct((num_layers, b_pad, h_pad), state_dtype),
            jax.ShapeDtypeStruct((num_layers, b_pad, h_pad), state_dtype),
        ),
        grid=(num_layers,),
        in_specs=[
            pl.BlockSpec((b_pad, x_pad), lambda l: (0, 0)),                 # x (resident)
            pl.BlockSpec((1, b_pad, h_pad), lambda l: (l, 0, 0)),           # h_0[l]
            pl.BlockSpec((1, b_pad, h_pad), lambda l: (l, 0, 0)),           # c_0[l]
            pl.BlockSpec((1, k_rows, 4 * h_pad), lambda l: (l, 0, 0)),      # fused W[l]
        ],
        out_specs=(
            pl.BlockSpec((1, b_pad, h_pad), lambda l: (l, 0, 0)),
            pl.BlockSpec((1, b_pad, h_pad), lambda l: (l, 0, 0)),
        ),
        scratch_shapes=[pltpu.VMEM((b_pad, k_rows), jnp.float32)],
        input_output_aliases={1: 0, 2: 1},     # h_0 -> h_1, c_0 -> c_1 in place
        compiler_params=pltpu.CompilerParams(
            dimension_semantics=("arbitrary",),
            vmem_limit_bytes=vmem_limit,
        ),
    )(x_p, h0_p, c0_p, w_s)

    h_1 = h_out_p[:, :batch, :rnn_size].astype(h_0.dtype)
    c_1 = c_out_p[:, :batch, :rnn_size].astype(c_0.dtype)
    return h_1[-1], (h_1, c_1)


def _reference_forward(input_feed, h_0, c_0, params, compute_dtype=None):
    """Pure-JAX reference (PyTorch LSTMCell math, eval-mode dropout).

    compute_dtype mimics the kernel's cast of x/h to the weight dtype before the
    dot (needed to compare against bf16-weight runs at tight tolerance).
    """
    h_1, c_1 = [], []
    x = input_feed.astype(jnp.float32)
    hdim = h_0.shape[-1]
    for i, (w_ih_t, w_hh_t, b) in enumerate(params):
        xi = x if compute_dtype is None else x.astype(compute_dtype)
        hi = h_0[i] if compute_dtype is None else h_0[i].astype(compute_dtype)
        gates = (
            jnp.dot(xi.astype(jnp.float32), w_ih_t.astype(jnp.float32),
                    precision=jax.lax.Precision.HIGHEST)
            + jnp.dot(hi.astype(jnp.float32), w_hh_t.astype(jnp.float32),
                      precision=jax.lax.Precision.HIGHEST)
            + b.astype(jnp.float32)
        )
        i_g = jax.nn.sigmoid(gates[:, 0 * hdim:1 * hdim])
        f_g = jax.nn.sigmoid(gates[:, 1 * hdim:2 * hdim])
        g_g = jnp.tanh(gates[:, 2 * hdim:3 * hdim])
        o_g = jax.nn.sigmoid(gates[:, 3 * hdim:4 * hdim])
        c_n = f_g * c_0[i].astype(jnp.float32) + i_g * g_g
        h_n = o_g * jnp.tanh(c_n)
        x = h_n
        h_1.append(h_n)
        c_1.append(c_n)
    return x, (jnp.stack(h_1), jnp.stack(c_1))


def init_params(key, num_layers, input_size, rnn_size, dtype=jnp.bfloat16):
    """PyTorch-shaped LSTMCell params, pre-transposed for the kernel.

    Default dtype is bf16: halves HBM/VMEM weight traffic; gate math stays f32.
    (bf16 truncates x/h at the dot -> small recurrent-state precision loss vs f32.)
    """
    params = []
    in_sz = input_size
    for _ in range(num_layers):
        key, k1, k2, k3, k4 = jax.random.split(key, 5)
        bound = 1.0 / jnp.sqrt(rnn_size)
        w_ih = jax.random.uniform(k1, (4 * rnn_size, in_sz), jnp.float32, -bound, bound)
        w_hh = jax.random.uniform(k2, (4 * rnn_size, rnn_size), jnp.float32, -bound, bound)
        b_ih = jax.random.uniform(k3, (4 * rnn_size,), jnp.float32, -bound, bound)
        b_hh = jax.random.uniform(k4, (4 * rnn_size,), jnp.float32, -bound, bound)
        params.append((
            jnp.transpose(w_ih).astype(dtype),   # (in, 4H)
            jnp.transpose(w_hh).astype(dtype),   # (H, 4H)
            (b_ih + b_hh).astype(dtype),         # (4H,)
        ))
        in_sz = rnn_size
    return params


if __name__ == "__main__":
    num_layers = 2
    batch = 2
    input_size = 48      # != rnn_size to exercise layer-0 vs layers>=1 K handling
    rnn_size = 32

    key = jax.random.PRNGKey(0)
    k_x, k_h, k_c, k_p = jax.random.split(key, 4)

    x = jax.random.normal(k_x, (batch, input_size), jnp.float32)
    h_0 = jax.random.normal(k_h, (num_layers, batch, rnn_size), jnp.float32)
    c_0 = jax.random.normal(k_c, (num_layers, batch, rnn_size), jnp.float32)

    fwd = jax.jit(stacked_lstm_forward)

    # --- f32 weights: tight check of the fused-dot / folded-bias math ---------
    params_f32 = init_params(k_p, num_layers, input_size, rnn_size, dtype=jnp.float32)
    out, (h_1, c_1) = fwd(x, h_0, c_0, params_f32)
    jax.block_until_ready((out, h_1, c_1))
    ref_out, (ref_h, ref_c) = _reference_forward(x, h_0, c_0, params_f32)
    assert out.shape == (batch, rnn_size)
    assert h_1.shape == (num_layers, batch, rnn_size)
    assert c_1.shape == (num_layers, batch, rnn_size)
    assert jnp.allclose(h_1, ref_h, atol=1e-3, rtol=1e-3)
    assert jnp.allclose(c_1, ref_c, atol=1e-3, rtol=1e-3)
    assert jnp.allclose(out, ref_out, atol=1e-3, rtol=1e-3)

    # --- bf16 weights (default, recommended): halves weight HBM/VMEM traffic --
    params_bf16 = init_params(k_p, num_layers, input_size, rnn_size)
    out_b, (h_1b, c_1b) = fwd(x, h_0, c_0, params_bf16)
    jax.block_until_ready((out_b, h_1b, c_1b))
    ref_out_b, (ref_hb, ref_cb) = _reference_forward(
        x, h_0, c_0, params_bf16, compute_dtype=jnp.bfloat16)
    assert jnp.allclose(h_1b, ref_hb, atol=5e-3, rtol=5e-3)
    assert jnp.allclose(c_1b, ref_cb, atol=5e-3, rtol=5e-3)
    assert jnp.allclose(out_b, ref_out_b, atol=5e-3, rtol=5e-3)

    print("KERNEL_OK")
</pallas_src>

<mosaic_0001>
module attributes {stable_mosaic.version = 11 : i64} {
  func.func @_stacked_lstm_kernel(%arg0: i32, %arg1: memref<8x128xf32, #tpu.memory_space<vmem>>, %arg2: memref<1x8x128xf32, #tpu.memory_space<vmem>>, %arg3: memref<1x8x128xf32, #tpu.memory_space<vmem>>, %arg4: memref<1x272x512xf32, #tpu.memory_space<vmem>>, %arg5: memref<1x8x128xf32, #tpu.memory_space<vmem>>, %arg6: memref<1x8x128xf32, #tpu.memory_space<vmem>>, %arg7: memref<8x272xf32, #tpu.memory_space<vmem>>) attributes {dimension_semantics = [#tpu.dimension_semantics<arbitrary>], iteration_bounds = array<i64: 2>, scalar_prefetch = 0 : i64, scratch_operands = 1 : i64, tpu.core_type = #tpu.core_type<tc>, window_params = [{pipeline_mode = #tpu.pipeline_mode<synchronous>, transform_indices = @transform_0, window_bounds = array<i64: 8, 128>}, {transform_indices = @transform_1, window_bounds = array<i64: 1, 8, 128>}, {transform_indices = @transform_2, window_bounds = array<i64: 1, 8, 128>}, {transform_indices = @transform_3, window_bounds = array<i64: 1, 272, 512>}, {transform_indices = @transform_4, window_bounds = array<i64: 1, 8, 128>}, {transform_indices = @transform_5, window_bounds = array<i64: 1, 8, 128>}]} {
    %c0_i32 = arith.constant 0 : i32
    %0 = arith.cmpi eq, %arg0, %c0_i32 : i32
    %1 = arith.extui %0 : i1 to i32
    %c0_i32_0 = arith.constant 0 : i32
    %2 = arith.cmpi ne, %1, %c0_i32_0 : i32
    scf.if %2 {
      %c0_29 = arith.constant 0 : index
      %c0_30 = arith.constant 0 : index
      %50 = vector.load %arg1[%c0_29, %c0_30] : memref<8x128xf32, #tpu.memory_space<vmem>>, vector<8x128xf32>
      %c0_31 = arith.constant 0 : index
      %c0_32 = arith.constant 0 : index
      %51 = vector.load %arg7[%c0_31, %c0_32] : memref<8x272xf32, #tpu.memory_space<vmem>>, vector<8x128xf32>
      tpu.vector_store %arg7[%c0_31, %c0_32], %50 {strides = array<i32>} : memref<8x272xf32, #tpu.memory_space<vmem>>, vector<8x128xf32>,
      %52 = tpu.iota {dimensions = array<i32: 1>} : vector<8x16xi32>
      %c0_i32_33 = arith.constant 0 : i32
      %53 = vector.broadcast %c0_i32_33 : i32 to vector<8x16xi32>
      %54 = arith.cmpi eq, %52, %53 : vector<8x16xi32>
      %55 = arith.extui %54 : vector<8x16xi1> to vector<8x16xi32>
      %56 = arith.sitofp %55 : vector<8x16xi32> to vector<8x16xf32>
      %c0_34 = arith.constant 0 : index
      %c256 = arith.constant 256 : index
      %57 = vector.load %arg7[%c0_34, %c256] : memref<8x272xf32, #tpu.memory_space<vmem>>, vector<8x16xf32>
      tpu.vector_store %arg7[%c0_34, %c256], %56 {strides = array<i32>} : memref<8x272xf32, #tpu.memory_space<vmem>>, vector<8x16xf32>,
    } else {
    }
    %c0 = arith.constant 0 : index
    %c0_1 = arith.constant 0 : index
    %c0_2 = arith.constant 0 : index
    %3 = vector.load %arg2[%c0, %c0_1, %c0_2] : memref<1x8x128xf32, #tpu.memory_space<vmem>>, vector<1x8x128xf32>
    %4 = vector.shape_cast %3 : vector<1x8x128xf32> to vector<8x128xf32>
    %c0_3 = arith.constant 0 : index
    %c128 = arith.constant 128 : index
    %5 = vector.load %arg7[%c0_3, %c128] : memref<8x272xf32, #tpu.memory_space<vmem>>, vector<8x128xf32>
    tpu.vector_store %arg7[%c0_3, %c128], %4 {strides = array<i32>} : memref<8x272xf32, #tpu.memory_space<vmem>>, vector<8x128xf32>,
    %c0_4 = arith.constant 0 : index
    %c0_5 = arith.constant 0 : index
    %c0_6 = arith.constant 0 : index
    %6 = vector.load %arg4[%c0_4, %c0_5, %c0_6] : memref<1x272x512xf32, #tpu.memory_space<vmem>>, vector<1x272x512xf32>
    %7 = vector.shape_cast %6 : vector<1x272x512xf32> to vector<272x512xf32>
    %c0_7 = arith.constant 0 : index
    %c0_8 = arith.constant 0 : index
    %8 = vector.load %arg7[%c0_7, %c0_8] : memref<8x272xf32, #tpu.memory_space<vmem>>, vector<8x272xf32>
    %cst = arith.constant dense<0.000000e+00> : vector<8x512xf32>
    %9 = tpu.matmul %8, %7, %cst {dimension_numbers = #tpu.dot_dimension_numbers<[1], [0], [0], [1], [0, 0, 1, 1], [], []>} : vector<8x272xf32>, vector<272x512xf32>, vector<8x512xf32> -> vector<8x512xf32>
    %10 = vector.extract_strided_slice %9 {offsets = [0, 0], sizes = [8, 128], strides = [1, 1]} : vector<8x512xf32> to vector<8x128xf32>
    %cst_9 = arith.constant 5.000000e-01 : f32
    %11 = vector.broadcast %cst_9 : f32 to vector<8x128xf32>
    %12 = arith.mulf %11, %10 : vector<8x128xf32>
    %13 = math.tanh %12 : vector<8x128xf32>
    %cst_10 = arith.constant 5.000000e-01 : f32
    %14 = vector.broadcast %cst_10 : f32 to vector<8x128xf32>
    %15 = arith.mulf %14, %13 : vector<8x128xf32>
    %cst_11 = arith.constant 5.000000e-01 : f32
    %16 = vector.broadcast %cst_11 : f32 to vector<8x128xf32>
    %17 = arith.addf %15, %16 : vector<8x128xf32>
    %18 = vector.extract_strided_slice %9 {offsets = [0, 128], sizes = [8, 128], strides = [1, 1]} : vector<8x512xf32> to vector<8x128xf32>
    %cst_12 = arith.constant 5.000000e-01 : f32
    %19 = vector.broadcast %cst_12 : f32 to vector<8x128xf32>
    %20 = arith.mulf %19, %18 : vector<8x128xf32>
    %21 = math.tanh %20 : vector<8x128xf32>
    %cst_13 = arith.constant 5.000000e-01 : f32
    %22 = vector.broadcast %cst_13 : f32 to vector<8x128xf32>
    %23 = arith.mulf %22, %21 : vector<8x128xf32>
    %cst_14 = arith.constant 5.000000e-01 : f32
    %24 = vector.broadcast %cst_14 : f32 to vector<8x128xf32>
    %25 = arith.addf %23, %24 : vector<8x128xf32>
    %26 = vector.extract_strided_slice %9 {offsets = [0, 256], sizes = [8, 128], strides = [1, 1]} : vector<8x512xf32> to vector<8x128xf32>
    %27 = math.tanh %26 : vector<8x128xf32>
    %28 = vector.extract_strided_slice %9 {offsets = [0, 384], sizes = [8, 128], strides = [1, 1]} : vector<8x512xf32> to vector<8x128xf32>
    %cst_15 = arith.constant 5.000000e-01 : f32
    %29 = vector.broadcast %cst_15 : f32 to vector<8x128xf32>
    %30 = arith.mulf %29, %28 : vector<8x128xf32>
    %31 = math.tanh %30 : vector<8x128xf32>
    %cst_16 = arith.constant 5.000000e-01 : f32
    %32 = vector.broadcast %cst_16 : f32 to vector<8x128xf32>
    %33 = arith.mulf %32, %31 : vector<8x128xf32>
    %cst_17 = arith.constant 5.000000e-01 : f32
    %34 = vector.broadcast %cst_17 : f32 to vector<8x128xf32>
    %35 = arith.addf %33, %34 : vector<8x128xf32>
    %c0_18 = arith.constant 0 : index
    %c0_19 = arith.constant 0 : index
    %c0_20 = arith.constant 0 : index
    %36 = vector.load %arg3[%c0_18, %c0_19, %c0_20] : memref<1x8x128xf32, #tpu.memory_space<vmem>>, vector<1x8x128xf32>
    %37 = vector.shape_cast %36 : vector<1x8x128xf32> to vector<8x128xf32>
    %38 = arith.mulf %25, %37 : vector<8x128xf32>
    %39 = arith.mulf %17, %27 : vector<8x128xf32>
    %40 = arith.addf %38, %39 : vector<8x128xf32>
    %41 = math.tanh %40 : vector<8x128xf32>
    %42 = arith.mulf %35, %41 : vector<8x128xf32>
    %c0_21 = arith.constant 0 : index
    %c0_22 = arith.constant 0 : index
    %c0_23 = arith.constant 0 : index
    %43 = vector.load %arg5[%c0_21, %c0_22, %c0_23] : memref<1x8x128xf32, #tpu.memory_space<vmem>>, vector<1x8x128xf32>
    %44 = vector.shape_cast %43 : vector<1x8x128xf32> to vector<8x128xf32>
    %45 = vector.shape_cast %42 : vector<8x128xf32> to vector<1x8x128xf32>
    tpu.vector_store %arg5[%c0_21, %c0_22, %c0_23], %45 {strides = array<i32>} : memref<1x8x128xf32, #tpu.memory_space<vmem>>, vector<1x8x128xf32>,
    %c0_24 = arith.constant 0 : index
    %c0_25 = arith.constant 0 : index
    %c0_26 = arith.constant 0 : index
    %46 = vector.load %arg6[%c0_24, %c0_25, %c0_26] : memref<1x8x128xf32, #tpu.memory_space<vmem>>, vector<1x8x128xf32>
    %47 = vector.shape_cast %46 : vector<1x8x128xf32> to vector<8x128xf32>
    %48 = vector.shape_cast %40 : vector<8x128xf32> to vector<1x8x128xf32>
    tpu.vector_store %arg6[%c0_24, %c0_25, %c0_26], %48 {strides = array<i32>} : memref<1x8x128xf32, #tpu.memory_space<vmem>>, vector<1x8x128xf32>,
    %c0_27 = arith.constant 0 : index
    %c0_28 = arith.constant 0 : index
    %49 = vector.load %arg7[%c0_27, %c0_28] : memref<8x272xf32, #tpu.memory_space<vmem>>, vector<8x128xf32>
    tpu.vector_store %arg7[%c0_27, %c0_28], %42 {strides = array<i32>} : memref<8x272xf32, #tpu.memory_space<vmem>>, vector<8x128xf32>,
    return
  }
  func.func @transform_0(%arg0: i32) -> (i32, i32) {
    %c0_i32 = arith.constant 0 : i32
    %c0_i32_0 = arith.constant 0 : i32
    %c0_i32_1 = arith.constant 0 : i32
    return %c0_i32, %c0_i32_0 : i32, i32
  }
  func.func @transform_1(%arg0: i32) -> (i32, i32, i32) {
    %c0_i32 = arith.constant 0 : i32
    %c0_i32_0 = arith.constant 0 : i32
    %c0_i32_1 = arith.constant 0 : i32
    return %arg0, %c0_i32, %c0_i32_0 : i32, i32, i32
  }
  func.func @transform_2(%arg0: i32) -> (i32, i32, i32) {
    %c0_i32 = arith.constant 0 : i32
    %c0_i32_0 = arith.constant 0 : i32
    %c0_i32_1 = arith.constant 0 : i32
    return %arg0, %c0_i32, %c0_i32_0 : i32, i32, i32
  }
  func.func @transform_3(%arg0: i32) -> (i32, i32, i32) {
    %c0_i32 = arith.constant 0 : i32
    %c0_i32_0 = arith.constant 0 : i32
    %c0_i32_1 = arith.constant 0 : i32
    return %arg0, %c0_i32, %c0_i32_0 : i32, i32, i32
  }
  func.func @transform_4(%arg0: i32) -> (i32, i32, i32) {
    %c0_i32 = arith.constant 0 : i32
    %c0_i32_0 = arith.constant 0 : i32
    %c0_i32_1 = arith.constant 0 : i32
    return %arg0, %c0_i32, %c0_i32_0 : i32, i32, i32
  }
  func.func @transform_5(%arg0: i32) -> (i32, i32, i32) {
    %c0_i32 = arith.constant 0 : i32
    %c0_i32_0 = arith.constant 0 : i32
    %c0_i32_1 = arith.constant 0 : i32
    return %arg0, %c0_i32, %c0_i32_0 : i32, i32, i32
  }
}

</mosaic_0001>

<bundles_post_ra>
// kernel: stacked_lstm_forward.1
= control target key start
LH: loop header
LB: loop body
LE: loop exit
PB: predicated region body
PF: predicated region fallthrough
CT: control target
= control target key end

     0   :  { %s873_s18 = smov 0   ;;  %s1088_s0 = inlined_call_operand.vmem [shape: f32[8,128], index: 0, kind: input, shape index: {}]   ;;  %s1089_s1 = inlined_call_operand.vmem [shape: f32[2,8,128], index: 1, kind: input, shape index: {}, may-alias: {1,4}]   ;;  %s1090_s2 = inlined_call_operand.vmem [shape: f32[2,8,128], index: 2, kind: input, shape index: {}, may-alias: {2,5}]   ;;  %s1091_s3 = inlined_call_operand.vmem [shape: f32[2,272,512], index: 3, kind: input, shape index: {}]   ;;  %s1092_s4 = inlined_call_operand.vmem [shape: f32[2,8,128], index: 4, kind: output, shape index: {0}, may-alias: {1,4}]   ;;  %s1093_s5 = inlined_call_operand.vmem [shape: f32[2,8,128], index: 5, kind: output, shape index: {1}, may-alias: {2,5}]  }
   0x1 LB: > { %s796_s19 = sadd.s32 4294967295, %s840_s18   ;;  %p800_p0 = scmp.ge.s32.totalorder %s840_s18, 1  ;;  %s840_s18 = sphi %s873_s18, %s16_s18  }
   0x2   : > { %p208_p1 = scmp.lt.s32.totalorder %s840_s18, 3 }
   0x4   : > { %p209_p2 = pnand %p800_p0, %p208_p1 }
   0x5   : > { %p247_p3 = scmp.lt.s32.totalorder (!%p209_p2), %s796_s19, 1  ;;  %p806_p4 = scmp.ne.s32.totalorder (!%p209_p2), %s796_s19, 0 }
   0x6   : > { %212 = sbr.rel (%p209_p2) target bundleno = 250 (0xfa), region = 36 }
   0xb   : > { %s248_s20 = scalar_select %p247_p3, %s796_s19, 1 }
   0xc   : > { %271 = sbr.rel (%p806_p4) target bundleno = 24 (0x18), region = 40 }
   0xd   : > { %s881_s21 = sshll.u32 %s248_s20, 3  ;;  %s814_s22 = smul.u32 1088, %s248_s20 }
   0xe   : > { %s250_s25 = scalar_lea.vmem %s1089_s1, %s881_s21  ;;  %s254_s28 = scalar_lea.vmem %s1090_s2, %s881_s21 }
   0xf   : > { %s894_s6 = scalar_lea.vmem %s1091_s3, %s814_s22  ;;  %s263_s9 = scalar_lea.vmem %s1092_s4, %s881_s21 }
  0x10   : > { %s267_s12 = scalar_lea.vmem %s1093_s5, %s881_s21 }
  0x11   : > { %v272_v0 = vld [vmem:[%s1088_s0] sm:$0xff]  ;;  %v274_v1 = vlaneseq  ;;  %vm279_vm0 = vcmask 130048   ;;  %v842_v3 = vmov 0.0  }
  0x12   : > { %273 = vst [vmem:[#allocation2] sm:$0xff] %v272_v0 }
  0x13   : > { %v275_v2 = vand.u32 127, %v274_v1 }
  0x15   : > { %vm276_vm1 = vcmp.eq.s32.totalorder %v275_v2, 0 }
  0x16   : > { %v807_v4 = vsel %vm276_vm1, 1.0, %v842_v3 }
  0x17   : > { %280 = vst.msk [vmem:[#allocation2 + $0x10] sm:$0xff] %vm279_vm0, %v807_v4 }
  0x18 PF: > { %v415_v5 = vld [vmem:[%s894_s6 + $0x420] sm:$0xff]  ;;  %v344_v7 = vld [vmem:[%s894_s6 + $0x1e8] sm:$0xff]  ;;  %vm422_vm2 = vcmask 130048  }
  0x19   : > { %v411_v6 = vld [vmem:[%s894_s6 + $0x400] sm:$0xff]  ;;  %480 = vmatpush.msra.mxu3 %v415_v5  ;;  %v408_v8 = vld [vmem:[%s894_s6 + $0x3e8] sm:$0xff] }
  0x1a   : > { %v343_v9 = vld [vmem:[%s894_s6 + $0x1e0] sm:$0xff]  ;;  %506 = vmatpush.msra.mxu2 %v408_v8  ;;  %v404_v11 = vld [vmem:[%s894_s6 + $0x3c8] sm:$0xff]  ;;  %v417_v8 = vld [vmem:[%s894_s6 + $0x430] sm:$0xff] }
  0x1b   : > { %426 = vmatpush.msra.mxu0 %v343_v9  ;;  %v407_v10 = vld [vmem:[%s894_s6 + $0x3e0] sm:$0xff]  ;;  %481 = vmatpush.msra.mxu3 %v411_v6  ;;  %v340_v12 = vld [vmem:[%s894_s6 + $0x1c8] sm:$0xff]  ;;  %v409_v9 = vld [vmem:[%s894_s6 + $0x3f0] sm:$0xff] }
  0x1c   : > { %446 = vmatpush.msra.mxu1 %v407_v10  ;;  %v339_v13 = vld [vmem:[%s894_s6 + $0x1c0] sm:$0xff]  ;;  %507 = vmatpush.msra.mxu2 %v404_v11  ;;  %v400_v15 = vld [vmem:[%s894_s6 + $0x3a8] sm:$0xff] }
  0x1d   : > { %v403_v14 = vld [vmem:[%s894_s6 + $0x3c0] sm:$0xff]  ;;  %486 = vmatpush.msrb.mxu3 %v344_v7  ;;  %v336_v18 = vld [vmem:[%s894_s6 + $0x1a8] sm:$0xff]  ;;  %427 = vmatpush.msra.mxu0 %v339_v13  ;;  %v413_v13 = vld [vmem:[%s894_s6 + $0x410] sm:$0xff] }
  0x1e   : > { %v335_v16 = vld [vmem:[%s894_s6 + $0x1a0] sm:$0xff]  ;;  %447 = vmatpush.msra.mxu1 %v403_v14  ;;  %v396_v19 = vld [vmem:[%s894_s6 + $0x388] sm:$0xff]  ;;  %508 = vmatpush.msra.mxu2 %v400_v15  ;;  %v969_v61 = vld [vmem:[#allocation2 + $0x10] sm:$0xff] }
  0x1f   : > { %v399_v17 = vld [vmem:[%s894_s6 + $0x3a0] sm:$0xff]  ;;  %487 = vmatpush.msrb.mxu3 %v340_v12  ;;  %v332_v22 = vld [vmem:[%s894_s6 + $0x188] sm:$0xff]  ;;  %428 = vmatpush.msra.mxu0 %v335_v16  ;;  %v405_v12 = vld [vmem:[%s894_s6 + $0x3d0] sm:$0xff] }
  0x20   : > { %v331_v20 = vld [vmem:[%s894_s6 + $0x180] sm:$0xff]  ;;  %448 = vmatpush.msra.mxu1 %v399_v17  ;;  %v392_v23 = vld [vmem:[%s894_s6 + $0x368] sm:$0xff]  ;;  %509 = vmatpush.msra.mxu2 %v396_v19  ;;  %v401_v14 = vld [vmem:[%s894_s6 + $0x3b0] sm:$0xff] }
  0x21   : > { %v395_v21 = vld [vmem:[%s894_s6 + $0x380] sm:$0xff]  ;;  %488 = vmatpush.msrb.mxu3 %v336_v18  ;;  %v328_v26 = vld [vmem:[%s894_s6 + $0x168] sm:$0xff]  ;;  %429 = vmatpush.msra.mxu0 %v331_v20  ;;  %v345_v15 = vld [vmem:[%s894_s6 + $0x1f0] sm:$0xff] }
  0x22   : > { %v327_v24 = vld [vmem:[%s894_s6 + $0x160] sm:$0xff]  ;;  %449 = vmatpush.msra.mxu1 %v395_v21  ;;  %v388_v27 = vld [vmem:[%s894_s6 + $0x348] sm:$0xff]  ;;  %510 = vmatpush.msra.mxu2 %v392_v23  ;;  %v410_v16 = vld [vmem:[%s894_s6 + $0x3f8] sm:$0xff] }
  0x23   : > { %v391_v25 = vld [vmem:[%s894_s6 + $0x360] sm:$0xff]  ;;  %489 = vmatpush.msrb.mxu3 %v332_v22  ;;  %v324_v30 = vld [vmem:[%s894_s6 + $0x148] sm:$0xff]  ;;  %430 = vmatpush.msra.mxu0 %v327_v24  ;;  %v397_v18 = vld [vmem:[%s894_s6 + $0x390] sm:$0xff] }
  0x24   : > { %v323_v28 = vld [vmem:[%s894_s6 + $0x140] sm:$0xff]  ;;  %450 = vmatpush.msra.mxu1 %v391_v25  ;;  %v384_v31 = vld [vmem:[%s894_s6 + $0x328] sm:$0xff]  ;;  %511 = vmatpush.msra.mxu2 %v388_v27  ;;  %v341_v19 = vld [vmem:[%s894_s6 + $0x1d0] sm:$0xff] }
  0x25   : > { %v387_v29 = vld [vmem:[%s894_s6 + $0x340] sm:$0xff]  ;;  %490 = vmatpush.msrb.mxu3 %v328_v26  ;;  %v320_v34 = vld [vmem:[%s894_s6 + $0x128] sm:$0xff]  ;;  %431 = vmatpush.msra.mxu0 %v323_v28  ;;  %v406_v20 = vld [vmem:[%s894_s6 + $0x3d8] sm:$0xff] }
  0x26   : > { %v319_v32 = vld [vmem:[%s894_s6 + $0x120] sm:$0xff]  ;;  %451 = vmatpush.msra.mxu1 %v387_v29  ;;  %v380_v35 = vld [vmem:[%s894_s6 + $0x308] sm:$0xff]  ;;  %512 = vmatpush.msra.mxu2 %v384_v31  ;;  %v393_v22 = vld [vmem:[%s894_s6 + $0x370] sm:$0xff] }
  0x27   : > { %v383_v33 = vld [vmem:[%s894_s6 + $0x320] sm:$0xff]  ;;  %491 = vmatpush.msrb.mxu3 %v324_v30  ;;  %v316_v38 = vld [vmem:[%s894_s6 + $0x108] sm:$0xff]  ;;  %432 = vmatpush.msra.mxu0 %v319_v32  ;;  %v337_v23 = vld [vmem:[%s894_s6 + $0x1b0] sm:$0xff] }
  0x28   : > { %v315_v36 = vld [vmem:[%s894_s6 + $0x100] sm:$0xff]  ;;  %452 = vmatpush.msra.mxu1 %v383_v33  ;;  %v376_v39 = vld [vmem:[%s894_s6 + $0x2e8] sm:$0xff]  ;;  %513 = vmatpush.msra.mxu2 %v380_v35  ;;  %v402_v24 = vld [vmem:[%s894_s6 + $0x3b8] sm:$0xff] }
  0x29   : > { %v379_v37 = vld [vmem:[%s894_s6 + $0x300] sm:$0xff]  ;;  %492 = vmatpush.msrb.mxu3 %v320_v34  ;;  %v312_v42 = vld [vmem:[%s894_s6 + $0xe8] sm:$0xff]  ;;  %433 = vmatpush.msra.mxu0 %v315_v36  ;;  %v346_v25 = vld [vmem:[%s894_s6 + $0x1f8] sm:$0xff] }
  0x2a   : > { %v311_v40 = vld [vmem:[%s894_s6 + $0xe0] sm:$0xff]  ;;  %453 = vmatpush.msra.mxu1 %v379_v37  ;;  %v372_v43 = vld [vmem:[%s894_s6 + $0x2c8] sm:$0xff]  ;;  %514 = vmatpush.msra.mxu2 %v376_v39  ;;  %v389_v26 = vld [vmem:[%s894_s6 + $0x350] sm:$0xff] }
  0x2b   : > { %v375_v41 = vld [vmem:[%s894_s6 + $0x2e0] sm:$0xff]  ;;  %493 = vmatpush.msrb.mxu3 %v316_v38  ;;  %v308_v46 = vld [vmem:[%s894_s6 + $0xc8] sm:$0xff]  ;;  %434 = vmatpush.msra.mxu0 %v311_v40  ;;  %v333_v27 = vld [vmem:[%s894_s6 + $0x190] sm:$0xff] }
  0x2c   : > { %v307_v44 = vld [vmem:[%s894_s6 + $0xc0] sm:$0xff]  ;;  %454 = vmatpush.msra.mxu1 %v375_v41  ;;  %v368_v47 = vld [vmem:[%s894_s6 + $0x2a8] sm:$0xff]  ;;  %515 = vmatpush.msra.mxu2 %v372_v43  ;;  %v398_v28 = vld [vmem:[%s894_s6 + $0x398] sm:$0xff] }
  0x2d   : > { %v371_v45 = vld [vmem:[%s894_s6 + $0x2c0] sm:$0xff]  ;;  %494 = vmatpush.msrb.mxu3 %v312_v42  ;;  %v304_v50 = vld [vmem:[%s894_s6 + $0xa8] sm:$0xff]  ;;  %435 = vmatpush.msra.mxu0 %v307_v44  ;;  %v385_v29 = vld [vmem:[%s894_s6 + $0x330] sm:$0xff] }
  0x2e   : > { %v303_v48 = vld [vmem:[%s894_s6 + $0xa0] sm:$0xff]  ;;  %455 = vmatpush.msra.mxu1 %v371_v45  ;;  %v364_v51 = vld [vmem:[%s894_s6 + $0x288] sm:$0xff]  ;;  %516 = vmatpush.msra.mxu2 %v368_v47  ;;  %v329_v30 = vld [vmem:[%s894_s6 + $0x170] sm:$0xff] }
  0x2f   : > { %v367_v49 = vld [vmem:[%s894_s6 + $0x2a0] sm:$0xff]  ;;  %495 = vmatpush.msrb.mxu3 %v308_v46  ;;  %v300_v54 = vld [vmem:[%s894_s6 + $0x88] sm:$0xff]  ;;  %436 = vmatpush.msra.mxu0 %v303_v48  ;;  %v342_v31 = vld [vmem:[%s894_s6 + $0x1d8] sm:$0xff] }
  0x30   : > { %v299_v52 = vld [vmem:[%s894_s6 + $0x80] sm:$0xff]  ;;  %456 = vmatpush.msra.mxu1 %v367_v49  ;;  %v360_v55 = vld [vmem:[%s894_s6 + $0x268] sm:$0xff]  ;;  %517 = vmatpush.msra.mxu2 %v364_v51  ;;  %v394_v32 = vld [vmem:[%s894_s6 + $0x378] sm:$0xff] }
  0x31   : > { %v363_v53 = vld [vmem:[%s894_s6 + $0x280] sm:$0xff]  ;;  %496 = vmatpush.msrb.mxu3 %v304_v50  ;;  %v296_v59 = vld [vmem:[%s894_s6 + $0x68] sm:$0xff]  ;;  %437 = vmatpush.msra.mxu0 %v299_v52  ;;  %v381_v33 = vld [vmem:[%s894_s6 + $0x310] sm:$0xff] }
  0x32   : > { %v963_v56 = vld [vmem:[%s250_s25] sm:$0xff]  ;;  %457 = vmatpush.msra.mxu1 %v363_v53  ;;  %v356_v60 = vld [vmem:[%s894_s6 + $0x248] sm:$0xff]  ;;  %518 = vmatpush.msra.mxu2 %v360_v55  ;;  %v325_v34 = vld [vmem:[%s894_s6 + $0x150] sm:$0xff] }
  0x33   : > { %v295_v57 = vld [vmem:[%s894_s6 + $0x60] sm:$0xff]  ;;  %497 = vmatpush.msrb.mxu3 %v300_v54  ;;  %v292_v63 = vld [vmem:[%s894_s6 + $0x48] sm:$0xff]  ;;  %v338_v35 = vld [vmem:[%s894_s6 + $0x1b8] sm:$0xff] }
  0x34   : > { %v359_v58 = vld [vmem:[%s894_s6 + $0x260] sm:$0xff]  ;;  %438 = vmatpush.msra.mxu0 %v295_v57  ;;  %519 = vmatpush.msra.mxu2 %v356_v60  ;;  %v352_v1 = vld [vmem:[%s894_s6 + $0x228] sm:$0xff]  ;;  %v390_v36 = vld [vmem:[%s894_s6 + $0x358] sm:$0xff] }
  0x35   : > { %v291_v62 = vld [vmem:[%s894_s6 + $0x40] sm:$0xff]  ;;  %458 = vmatpush.msra.mxu1 %v359_v58  ;;  %498 = vmatpush.msrb.mxu3 %v296_v59  ;;  %v288_v3 = vld [vmem:[%s894_s6 + $0x28] sm:$0xff]  ;;  %v377_v37 = vld [vmem:[%s894_s6 + $0x2f0] sm:$0xff] }
  0x36   : > { %v355_v0 = vld [vmem:[%s894_s6 + $0x240] sm:$0xff]  ;;  %808 = vmatmul.msk.f32.vlgmr.msra.gmra.mxu3 %vm422_vm2, %v969_v61  ;;  %439 = vmatpush.msra.mxu0 %v291_v62  ;;  %v348_v5 = vld [vmem:[%s894_s6 + $0x208] sm:$0xff]  ;;  %v321_v38 = vld [vmem:[%s894_s6 + $0x130] sm:$0xff] }
  0x37   : > { %v287_v2 = vld [vmem:[%s894_s6 + $0x20] sm:$0xff]  ;;  %499 = vmatpush.msrb.mxu3 %v292_v63  ;;  %459 = vmatpush.msra.mxu1 %v355_v0  ;;  %v284_v7 = vld [vmem:[%s894_s6 + $0x8] sm:$0xff]  ;;  %v334_v39 = vld [vmem:[%s894_s6 + $0x198] sm:$0xff] }
  0x38   : > { %v351_v4 = vld [vmem:[%s894_s6 + $0x220] sm:$0xff]  ;;  %520 = vmatpush.msra.mxu2 %v352_v1  ;;  %440 = vmatpush.msra.mxu0 %v287_v2  ;;  %v416_v17 = vld [vmem:[%s894_s6 + $0x428] sm:$0xff]  ;;  %v386_v40 = vld [vmem:[%s894_s6 + $0x338] sm:$0xff] }
  0x39   : > { %v283_v6 = vld [vmem:[%s894_s6] sm:$0xff]  ;;  %500 = vmatpush.msrb.mxu3 %v288_v3  ;;  %460 = vmatpush.msra.mxu1 %v351_v4  ;;  %v412_v21 = vld [vmem:[%s894_s6 + $0x408] sm:$0xff]  ;;  %v373_v41 = vld [vmem:[%s894_s6 + $0x2d0] sm:$0xff] }
  0x3a   : > { %v347_v10 = vld [vmem:[%s894_s6 + $0x200] sm:$0xff]  ;;  %521 = vmatpush.msra.mxu2 %v348_v5  ;;  %441 = vmatpush.msra.mxu0 %v283_v6  ;;  %v317_v42 = vld [vmem:[%s894_s6 + $0x110] sm:$0xff]  ;;  %v330_v43 = vld [vmem:[%s894_s6 + $0x178] sm:$0xff] }
  0x3b   : > { %v986_v11 = vld [vmem:[#allocation2] sm:$0xff]  ;;  %501 = vmatpush.msrb.mxu3 %v284_v7  ;;  %461 = vmatpush.msra.mxu1 %v347_v10  ;;  %v382_v44 = vld [vmem:[%s894_s6 + $0x318] sm:$0xff]  ;;  %v369_v45 = vld [vmem:[%s894_s6 + $0x2b0] sm:$0xff] }
  0x3c   : > { %600 = vmatpush.msrb.mxu2 %v417_v8  ;;  %442 = vmatmul.f32.vlgmr.msra.gmra.mxu0 %v986_v11  ;;  %v313_v46 = vld [vmem:[%s894_s6 + $0xf0] sm:$0xff]  ;;  %v326_v47 = vld [vmem:[%s894_s6 + $0x158] sm:$0xff] }
  0x3d   : > { %566 = vmatpush.msra.mxu3 %v409_v9  ;;  %462 = vmatmul.f32.vlgmr.msra.gmra.mxu1 %v963_v56  ;;  %v378_v48 = vld [vmem:[%s894_s6 + $0x2f8] sm:$0xff]  ;;  %v365_v49 = vld [vmem:[%s894_s6 + $0x290] sm:$0xff] }
  0x3e   : > { %601 = vmatpush.msrb.mxu2 %v413_v13  ;;  %502 = vmatmul.f32.vlgmr.msrb.gmra.mxu3 %v986_v11  ;;  %v309_v50 = vld [vmem:[%s894_s6 + $0xd0] sm:$0xff]  ;;  %v322_v51 = vld [vmem:[%s894_s6 + $0x138] sm:$0xff] }
  0x3f   : > { %567 = vmatpush.msra.mxu3 %v405_v12  ;;  %522 = vmatmul.f32.vlgmr.msra.gmra.mxu2 %v963_v56  ;;  %v374_v52 = vld [vmem:[%s894_s6 + $0x2d8] sm:$0xff]  ;;  %v361_v53 = vld [vmem:[%s894_s6 + $0x270] sm:$0xff] }
  0x40   : > { %546 = vmatpush.msrb.mxu1 %v345_v15  ;;  %626 = vmatpush.msra.mxu2 %v410_v16  ;;  %v305_v54 = vld [vmem:[%s894_s6 + $0xb0] sm:$0xff]  ;;  %v318_v55 = vld [vmem:[%s894_s6 + $0x118] sm:$0xff] }
  0x41   : > { %568 = vmatpush.msra.mxu3 %v401_v14  ;;  %540 = vmatpush.msrb.mxu0 %v416_v17  ;;  %v370_v57 = vld [vmem:[%s894_s6 + $0x2b8] sm:$0xff]  ;;  %v357_v58 = vld [vmem:[%s894_s6 + $0x250] sm:$0xff] }
  0x42   : > { %547 = vmatpush.msrb.mxu1 %v341_v19  ;;  %627 = vmatpush.msra.mxu2 %v406_v20  ;;  %v301_v59 = vld [vmem:[%s894_s6 + $0x90] sm:$0xff]  ;;  %v314_v60 = vld [vmem:[%s894_s6 + $0xf8] sm:$0xff] }
  0x43   : > { %569 = vmatpush.msra.mxu3 %v397_v18  ;;  %541 = vmatpush.msrb.mxu0 %v412_v21  ;;  %v366_v62 = vld [vmem:[%s894_s6 + $0x298] sm:$0xff]  ;;  %v353_v63 = vld [vmem:[%s894_s6 + $0x230] sm:$0xff] }
  0x44   : > { %548 = vmatpush.msrb.mxu1 %v337_v23  ;;  %628 = vmatpush.msra.mxu2 %v402_v24  ;;  %v297_v0 = vld [vmem:[%s894_s6 + $0x70] sm:$0xff]  ;;  %v310_v1 = vld [vmem:[%s894_s6 + $0xd8] sm:$0xff] }
  0x45   : > { %570 = vmatpush.msra.mxu3 %v393_v22  ;;  %606 = vmatpush.msra.mxu0 %v346_v25  ;;  %v362_v2 = vld [vmem:[%s894_s6 + $0x278] sm:$0xff]  ;;  %v349_v3 = vld [vmem:[%s894_s6 + $0x210] sm:$0xff] }
  0x46   : > { %549 = vmatpush.msrb.mxu1 %v333_v27  ;;  %629 = vmatpush.msra.mxu2 %v398_v28  ;;  %v293_v4 = vld [vmem:[%s894_s6 + $0x50] sm:$0xff]  ;;  %v306_v5 = vld [vmem:[%s894_s6 + $0xb8] sm:$0xff] }
  0x47   : > { %571 = vmatpush.msra.mxu3 %v389_v26  ;;  %809 = vmatmul.msk.f32.vlgmr.msrb.gmra.mxu0 %vm422_vm2, %v969_v61  ;;  %v358_v6 = vld [vmem:[%s894_s6 + $0x258] sm:$0xff]  ;;  %v289_v7 = vld [vmem:[%s894_s6 + $0x30] sm:$0xff] }
  0x48   : > { %550 = vmatpush.msrb.mxu1 %v329_v30  ;;  %607 = vmatpush.msra.mxu0 %v342_v31  ;;  %v302_v8 = vld [vmem:[%s894_s6 + $0x98] sm:$0xff]  ;;  %v285_v10 = vld [vmem:[%s894_s6 + $0x10] sm:$0xff] }
  0x49   : > { %572 = vmatpush.msra.mxu3 %v385_v29  ;;  %630 = vmatpush.msra.mxu2 %v394_v32  ;;  %v354_v9 = vld [vmem:[%s894_s6 + $0x238] sm:$0xff] }
  0x4a   : > { %551 = vmatpush.msrb.mxu1 %v325_v34  ;;  %608 = vmatpush.msra.mxu0 %v338_v35  ;;  %v298_v12 = vld [vmem:[%s894_s6 + $0x78] sm:$0xff] }
  0x4b   : > { %573 = vmatpush.msra.mxu3 %v381_v33  ;;  %631 = vmatpush.msra.mxu2 %v390_v36  ;;  %v350_v13 = vld [vmem:[%s894_s6 + $0x218] sm:$0xff] }
  0x4c   : > { %552 = vmatpush.msrb.mxu1 %v321_v38  ;;  %609 = vmatpush.msra.mxu0 %v334_v39  ;;  %v418_v14 = vld [vmem:[%s894_s6 + $0x438] sm:$0xff] }
  0x4d   : > { %574 = vmatpush.msra.mxu3 %v377_v37  ;;  %632 = vmatpush.msra.mxu2 %v386_v40  ;;  %v294_v15 = vld [vmem:[%s894_s6 + $0x58] sm:$0xff] }
  0x4e   : > { %553 = vmatpush.msrb.mxu1 %v317_v42  ;;  %610 = vmatpush.msra.mxu0 %v330_v43  ;;  %v290_v16 = vld [vmem:[%s894_s6 + $0x38] sm:$0xff]  ;;  %v679_v42 = vld [vmem:[%s254_s28] sm:$0xff] }
  0x4f   : > { %575 = vmatpush.msra.mxu3 %v373_v41  ;;  %633 = vmatpush.msra.mxu2 %v382_v44  ;;  %v414_v17 = vld [vmem:[%s894_s6 + $0x418] sm:$0xff] }
  0x50   : > { %554 = vmatpush.msrb.mxu1 %v313_v46  ;;  %611 = vmatpush.msra.mxu0 %v326_v47  ;;  %v286_v18 = vld [vmem:[%s894_s6 + $0x18] sm:$0xff] }
  0x51   : > { %576 = vmatpush.msra.mxu3 %v369_v45  ;;  %634 = vmatpush.msra.mxu2 %v378_v48 }
  0x52   : > { %555 = vmatpush.msrb.mxu1 %v309_v50  ;;  %612 = vmatpush.msra.mxu0 %v322_v51 }
  0x53   : > { %577 = vmatpush.msra.mxu3 %v365_v49  ;;  %635 = vmatpush.msra.mxu2 %v374_v52 }
  0x54   : > { %556 = vmatpush.msrb.mxu1 %v305_v54  ;;  %613 = vmatpush.msra.mxu0 %v318_v55 }
  0x55   : > { %578 = vmatpush.msra.mxu3 %v361_v53  ;;  %636 = vmatpush.msra.mxu2 %v370_v57 }
  0x56   : > { %557 = vmatpush.msrb.mxu1 %v301_v59  ;;  %614 = vmatpush.msra.mxu0 %v314_v60 }
  0x57   : > { %579 = vmatpush.msra.mxu3 %v357_v58  ;;  %637 = vmatpush.msra.mxu2 %v366_v62 }
  0x58   : > { %810 = vmatmul.msk.f32.vlgmr.msrb.gmra.mxu2 %vm422_vm2, %v969_v61  ;;  %558 = vmatpush.msrb.mxu1 %v297_v0 }
  0x59   : > { %580 = vmatpush.msra.mxu3 %v353_v63  ;;  %615 = vmatpush.msra.mxu0 %v310_v1 }
  0x5a   : > { %638 = vmatpush.msra.mxu2 %v362_v2  ;;  %559 = vmatpush.msrb.mxu1 %v293_v4 }
  0x5b   : > { %581 = vmatpush.msra.mxu3 %v349_v3  ;;  %616 = vmatpush.msra.mxu0 %v306_v5 }
  0x5c   : > { %582 = vmatmul.f32.vlgmr.msra.gmra.mxu3 %v963_v56  ;;  %639 = vmatpush.msra.mxu2 %v358_v6 }
  0x5d   : > { %560 = vmatpush.msrb.mxu1 %v289_v7  ;;  %617 = vmatpush.msra.mxu0 %v302_v8 }
  0x5e   : > { %640 = vmatpush.msra.mxu2 %v354_v9 }
  0x5f   : > { %561 = vmatpush.msrb.mxu1 %v285_v10  ;;  %618 = vmatpush.msra.mxu0 %v298_v12 }
  0x60   : > { %641 = vmatpush.msra.mxu2 %v350_v13  ;;  %562 = vmatmul.f32.vlgmr.msrb.gmra.mxu1 %v986_v11 }
  0x61   : > { %642 = vmatmul.f32.vlgmr.msra.gmra.mxu2 %v963_v56  ;;  %660 = vmatpush.msra.mxu1 %v418_v14 }
  0x62   : > { %619 = vmatpush.msra.mxu0 %v294_v15 }
  0x63   : > { %661 = vmatpush.msra.mxu1 %v414_v17 }
  0x64   : > { %620 = vmatpush.msra.mxu0 %v290_v16 }
  0x66   : > { %621 = vmatpush.msra.mxu0 %v286_v18 }
  0x67   : > { %622 = vmatmul.f32.vlgmr.msra.gmra.mxu0 %v986_v11 }
  0x68   : > { %811 = vmatmul.msk.f32.vlgmr.msra.gmra.mxu1 %vm422_vm2, %v969_v61 }
  0xb9   : > { %v483_v19 = vpop.f32.mrf.mxu3  ;;  %v443_v20 = vpop.f32.mrf.mxu0 }
  0xba   : > { %v463_v23 = vpop.f32.mrf.mxu1 }
  0xbb   : > { %v464_v25 = vadd.f32 %v463_v23, %v443_v20 }
  0xbd   : > { %v484_v27 = vadd.f32 %v483_v19, %v464_v25 }
  0xbf   : > { %v666_v29 = vmul.f32 0.5, %v484_v27 }
  0xc1   : > { %v503_v21 = vpop.f32.mrf.mxu3 }
  0xc2   : > { %v523_v22 = vpop.f32.mrf.mxu2 }
  0xc3   : > { %v524_v24 = vadd.f32 %v523_v22, %v503_v21 }
  0xc4   : > { %v543_v56 = vpop.f32.mrf.mxu0 }
  0xc5   : > { %v544_v26 = vadd.f32 %v543_v56, %v524_v24 }
  0xc7   : > { %v670_v28 = vmul.f32 0.5, %v544_v26 }
  0xc9   : > { %824 = vtanh.f32 %v670_v28 }
  0xca   : > { %826 = vtanh.f32 %v666_v29 }
  0xcf   : > { %v825_v32 = vpop.eup %824 }
  0xd0   : > { %v827_v33 = vpop.eup %826  ;;  %v672_v35 = vmul.f32 0.5, %v825_v32 }
  0xd1   : > { %v668_v36 = vmul.f32 0.5, %v827_v33 }
  0xd2   : > { %v673_v40 = vadd.f32 0.5, %v672_v35 }
  0xd3   : > { %v669_v44 = vadd.f32 0.5, %v668_v36 }
  0xd4   : > { %v680_v47 = vmul.f32 %v679_v42, %v673_v40 }
  0xdb   : > { %v603_v30 = vpop.f32.mrf.mxu2 }
  0xdd   : > { %v563_v11 = vpop.f32.mrf.mxu1 }
  0xdf   : > { %v583_v31 = vpop.f32.mrf.mxu3 }
  0xe0   : > { %v584_v61 = vadd.f32 %v583_v31, %v563_v11 }
  0xe2   : > { %v604_v34 = vadd.f32 %v603_v30, %v584_v61 }
  0xe4   : > { %828 = vtanh.f32 %v604_v34  ;;  %v623_v37 = vpop.f32.mrf.mxu0  ;;  %v643_v38 = vpop.f32.mrf.mxu2 }
  0xe5   : > { %v644_v39 = vadd.f32 %v643_v38, %v623_v37  ;;  %v663_v41 = vpop.f32.mrf.mxu1 }
  0xe7   : > { %v664_v43 = vadd.f32 %v663_v41, %v644_v39 }
  0xe9   : > { %v675_v46 = vmul.f32 0.5, %v664_v43 }
  0xea   : > { %v829_v45 = vpop.eup %828 }
  0xeb   : > { %v681_v48 = vmul.f32 %v829_v45, %v669_v44  ;;  %830 = vtanh.f32 %v675_v46 }
  0xed   : > { %v682_v49 = vadd.f32 %v681_v48, %v680_v47 }
  0xef   : > { %686 = vst [vmem:[%s267_s12] sm:$0xff] %v682_v49  ;;  %832 = vtanh.f32 %v682_v49 }
  0xf1   : > { %v831_v50 = vpop.eup %830 }
  0xf2   : > { %v677_v51 = vmul.f32 0.5, %v831_v50 }
  0xf4   : > { %v678_v53 = vadd.f32 0.5, %v677_v51 }
  0xf5   : > { %v833_v52 = vpop.eup %832 }
  0xf6   : > { %v684_v54 = vmul.f32 %v833_v52, %v678_v53 }
  0xf8   : > { %685 = vst [vmem:[%s263_s9] sm:$0xff] %v684_v54 }
  0xf9   : > { %687 = vst [vmem:[#allocation2] sm:$0xff] %v684_v54 }
  0xfa PF: > { %s16_s18 = sadd.s32 1, %s840_s18  }
  0xfb   : > { %p13_p5 = scmp.ge.s32.totalorder %s16_s18, 4  }
  0xfd   :  { %15 = sbr.rel (!%p13_p5) target bundleno = 1 (0x1), region = 88 }

</bundles_post_ra>
